<compile_context>
chip_gen: v6e
topology: v6e:2x2x1
jax: 0.10.0
libtpu: 0.0.40
codegen_flags: <defaults>
</compile_context>

<pallas_src>
import jax
import jax.numpy as jnp
from jax import lax
from jax.experimental import pallas as pl
from jax.experimental.pallas import tpu as pltpu


# ---------------------------------------------------------------------------
# Kernel 1: 1x1 convolution == row-tiled matmul  y = x @ W + b  (channels-last)
# ---------------------------------------------------------------------------
def _pointwise_kernel(x_ref, w_ref, b_ref, o_ref):
    x = x_ref[...].astype(jnp.float32)
    w = w_ref[...].astype(jnp.float32)
    acc = jnp.dot(x, w, preferred_element_type=jnp.float32)
    o_ref[...] = (acc + b_ref[...].astype(jnp.float32)).astype(o_ref.dtype)


def pointwise_conv(x2d, w, b, *, row_tile_cap=1024):
    """x2d: (rows, Cin);  w: (Cin, Cout);  b: (Cout,)  ->  (rows, Cout)."""
    rows, cin = x2d.shape
    cout = w.shape[1]
    # Large tile to amortize per-grid-step overhead, but keep >=2 grid steps
    # (when possible) so two TensorCores can split the parallel axis.
    row_tile = min(row_tile_cap, max(8, (((rows + 1) // 2) + 7) // 8 * 8))
    grid = (pl.cdiv(rows, row_tile),)                    # masked partial last block
    return pl.pallas_call(
        _pointwise_kernel,
        out_shape=jax.ShapeDtypeStruct((rows, cout), x2d.dtype),
        grid_spec=pltpu.PrefetchScalarGridSpec(
            num_scalar_prefetch=0,
            grid=grid,
            in_specs=[
                pl.BlockSpec((row_tile, cin), lambda i: (i, 0)),
                pl.BlockSpec((cin, cout), lambda i: (0, 0)),
                pl.BlockSpec((1, cout), lambda i: (0, 0)),
            ],
            out_specs=pl.BlockSpec((row_tile, cout), lambda i: (i, 0)),
        ),
        compiler_params=pltpu.CompilerParams(dimension_semantics=("parallel",)),
    )(x2d, w, b.reshape(1, cout))


# ---------------------------------------------------------------------------
# Kernel 2: depthwise 3x3 conv, stride 1, padding 1, groups == channels (NHWC)
# ---------------------------------------------------------------------------
def _dwconv3x3_kernel(xp_ref, w_ref, b_ref, o_ref):
    # xp_ref: (H+2, W+2, C) spatially pre-padded tile; w_ref: (3,3,C);
    # b_ref: (1, C); o_ref: (H, W, C). Channels live on the lane axis.
    H, W, C = o_ref.shape
    xp = xp_ref[...].astype(jnp.float32)
    w = w_ref[...].astype(jnp.float32)
    acc = jnp.zeros((H, W, C), jnp.float32)
    for dy in range(3):                                   # 9 taps, unrolled
        for dx in range(3):
            acc = acc + xp[dy:dy + H, dx:dx + W, :] * w[dy, dx, :]
    acc = acc + b_ref[...].astype(jnp.float32)
    o_ref[...] = acc.astype(o_ref.dtype)


def dwconv3x3(x_nhwc, w, b):
    """x_nhwc: (B,H,W,C);  w: (3,3,C);  b: (C,)  ->  (B,H,W,C)."""
    B, H, W, C = x_nhwc.shape
    xp = jnp.pad(x_nhwc, ((0, 0), (1, 1), (1, 1), (0, 0)))   # conv halo
    return pl.pallas_call(
        _dwconv3x3_kernel,
        out_shape=jax.ShapeDtypeStruct((B, H, W, C), x_nhwc.dtype),
        grid_spec=pltpu.PrefetchScalarGridSpec(
            num_scalar_prefetch=0,
            grid=(B,),
            in_specs=[
                pl.BlockSpec((None, H + 2, W + 2, C), lambda i: (i, 0, 0, 0)),
                pl.BlockSpec((3, 3, C), lambda i: (0, 0, 0)),
                pl.BlockSpec((1, C), lambda i: (0, 0)),
            ],
            out_specs=pl.BlockSpec((None, H, W, C), lambda i: (i, 0, 0, 0)),
        ),
        compiler_params=pltpu.CompilerParams(dimension_semantics=("parallel",)),
    )(xp, w, b.reshape(1, C))


# ---------------------------------------------------------------------------
# Kernel 3: fused channel attention (all heads) + output projection, per batch
#   q, k, v : (HW, C)  tokens-major / channels-last (straight from the convs)
#   t_row   : (C, 1)   temperature repeated per channel of its head
#   bias    : (C, C)   0 inside each head's block, -1e30 outside (head mask)
#   wp, bp  : (C, C) / (C, 1) projection weight & bias
#   o_ref   : (C, HW)  channel-major -> reshapes straight to NCHW, lane-dense
# ---------------------------------------------------------------------------
def _attn_project_kernel(q_ref, k_ref, v_ref, t_ref, bias_ref, wp_ref, bp_ref,
                         o_ref):
    q = q_ref[...].astype(jnp.float32)                    # (HW, C)
    k = k_ref[...].astype(jnp.float32)
    v = v_ref[...].astype(jnp.float32)

    # F.normalize(dim=-1) over the token axis (axis 0 here), eps = 1e-12:
    #   x / max(||x||, eps) == x * rsqrt(max(sum(x^2), eps^2))  (EUP rsqrt)
    q = q * lax.rsqrt(jnp.maximum(jnp.sum(q * q, axis=0, keepdims=True), 1e-24))
    k = k * lax.rsqrt(jnp.maximum(jnp.sum(k * k, axis=0, keepdims=True), 1e-24))

    # Gram matrix over ALL heads at once (contract the long token axis):
    #   g[i, j] = q[:, i] . k[:, j]
    g = lax.dot_general(q, k, (((0,), (0,)), ((), ())),
                        preferred_element_type=jnp.float32)
    # per-head temperature (row scale) + block-diagonal head mask (additive)
    g = g * t_ref[...].astype(jnp.float32) + bias_ref[...].astype(jnp.float32)

    # row softmax; cross-head entries carry -1e30 -> exp == 0 exactly
    g = g - jnp.max(g, axis=-1, keepdims=True)
    e = jnp.exp(g)
    a = e * pl.reciprocal(jnp.sum(e, axis=-1, keepdims=True), approx=True)

    # attention output, channel-major:  o_t[i, hw] = sum_j a[i, j] * v[hw, j]
    o_t = lax.dot_general(a, v, (((1,), (1,)), ((), ())),
                          preferred_element_type=jnp.float32)
    # projection, still channel-major:  y[co, hw] = sum_i wp[i, co] * o_t[i, hw]
    y = lax.dot_general(wp_ref[...].astype(jnp.float32), o_t,
                        (((0,), (0,)), ((), ())),
                        preferred_element_type=jnp.float32)
    o_ref[...] = (y + bp_ref[...].astype(jnp.float32)).astype(o_ref.dtype)


def fused_attention_project(q2d, k2d, v2d, t_row, attn_bias, w_proj, b_proj):
    """q2d/k2d/v2d: (B, HW, C) -> (B, C, HW) projected output."""
    B, HW, C = q2d.shape

    def qkv_spec():
        return pl.BlockSpec((None, HW, C), lambda b: (b, 0, 0))

    return pl.pallas_call(
        _attn_project_kernel,
        out_shape=jax.ShapeDtypeStruct((B, C, HW), q2d.dtype),
        grid_spec=pltpu.PrefetchScalarGridSpec(
            num_scalar_prefetch=0,
            grid=(B,),
            in_specs=[
                qkv_spec(), qkv_spec(), qkv_spec(),
                pl.BlockSpec((C, 1), lambda b: (0, 0)),
                pl.BlockSpec((C, C), lambda b: (0, 0)),
                pl.BlockSpec((C, C), lambda b: (0, 0)),
                pl.BlockSpec((C, 1), lambda b: (0, 0)),
            ],
            out_specs=pl.BlockSpec((None, C, HW), lambda b: (b, 0, 0)),
        ),
        compiler_params=pltpu.CompilerParams(dimension_semantics=("parallel",)),
    )(q2d, k2d, v2d, t_row, attn_bias, w_proj, b_proj)


# ---------------------------------------------------------------------------
# Full forward (mirrors Attention.forward, NCHW in / NCHW out)
# ---------------------------------------------------------------------------
def attention_forward(x, params):
    B, C, H, W = x.shape
    num_heads = params["num_heads"]
    c_head = C // num_heads
    HW = H * W

    # The only transpose in the whole forward: NCHW -> NHWC for the convs.
    x_nhwc = jnp.transpose(x, (0, 2, 3, 1))                       # (B,H,W,C)

    # qkv = qkv_dwconv(qkv(x))
    qkv = pointwise_conv(x_nhwc.reshape(B * HW, C),
                         params["w_qkv"], params["b_qkv"])        # (B*HW, 3C)
    qkv = dwconv3x3(qkv.reshape(B, H, W, 3 * C),
                    params["w_dw"], params["b_dw"])               # (B,H,W,3C)

    # split channels (torch's qkv.chunk(3, dim=1)) — stays channels-last
    qkv = qkv.reshape(B, HW, 3 * C)
    q2d = qkv[..., :C]
    k2d = qkv[..., C:2 * C]
    v2d = qkv[..., 2 * C:]

    # per-channel temperature row and block-diagonal per-head mask (additive)
    t_row = jnp.repeat(params["temperature"].reshape(num_heads),
                       c_head).reshape(C, 1).astype(jnp.float32)
    head_id = jnp.arange(C, dtype=jnp.int32) // c_head
    attn_bias = jnp.where(head_id[:, None] == head_id[None, :],
                          0.0, -1e30).astype(jnp.float32)

    y_t = fused_attention_project(q2d, k2d, v2d, t_row, attn_bias,
                                  params["w_proj"],
                                  params["b_proj"].reshape(C, 1))  # (B,C,HW)
    return y_t.reshape(B, C, H, W)                                 # NCHW


# ---------------------------------------------------------------------------
# Pure-JAX reference (same parameterization) for correctness check
# ---------------------------------------------------------------------------
def attention_reference(x, params):
    B, C, H, W = x.shape
    nh = params["num_heads"]
    ch = C // nh
    HW = H * W

    xl = jnp.transpose(x, (0, 2, 3, 1)).reshape(B, HW, C)
    qkv = xl @ params["w_qkv"] + params["b_qkv"]
    qkv = qkv.reshape(B, H, W, 3 * C)

    xp = jnp.pad(qkv, ((0, 0), (1, 1), (1, 1), (0, 0)))
    dw = jnp.zeros_like(qkv)
    for dy in range(3):
        for dx in range(3):
            dw = dw + xp[:, dy:dy + H, dx:dx + W, :] * params["w_dw"][dy, dx, :]
    dw = dw + params["b_dw"]

    qkv = dw.reshape(B, HW, 3, nh, ch)
    qkv = jnp.transpose(qkv, (2, 0, 3, 4, 1))
    q, k, v = qkv[0], qkv[1], qkv[2]

    q = q * lax.rsqrt(jnp.maximum(jnp.sum(q * q, -1, keepdims=True), 1e-24))
    k = k * lax.rsqrt(jnp.maximum(jnp.sum(k * k, -1, keepdims=True), 1e-24))
    attn = jnp.einsum("bhcd,bhed->bhce", q, k) * params["temperature"][None]
    attn = jax.nn.softmax(attn, axis=-1)
    out = jnp.einsum("bhce,bhed->bhcd", attn, v)

    out = jnp.transpose(out, (0, 3, 1, 2)).reshape(B, HW, C)
    y = out @ params["w_proj"] + params["b_proj"]
    return jnp.transpose(y.reshape(B, H, W, C), (0, 3, 1, 2))


if __name__ == "__main__":
    key = jax.random.PRNGKey(0)
    B, C, H, W = 2, 32, 16, 16
    num_heads = 4
    keys = jax.random.split(key, 7)

    def init(k, shape, fan_in):
        return jax.random.normal(k, shape, dtype=jnp.float32) / jnp.sqrt(fan_in)

    params = {
        "num_heads": num_heads,
        # 1x1 qkv conv: (Cin, 3*Cin) + bias
        "w_qkv": init(keys[0], (C, 3 * C), C),
        "b_qkv": init(keys[1], (3 * C,), C),
        # depthwise 3x3 conv: (3, 3, 3*Cin) + bias
        "w_dw": init(keys[2], (3, 3, 3 * C), 9.0),
        "b_dw": init(keys[3], (3 * C,), 9.0),
        # 1x1 projection conv
        "w_proj": init(keys[4], (C, C), C),
        "b_proj": init(keys[5], (C,), C),
        # temperature initialized to ones, exactly like the module's __init__
        "temperature": jnp.ones((num_heads, 1, 1), dtype=jnp.float32),
    }
    x = jax.random.normal(keys[6], (B, C, H, W), dtype=jnp.float32)

    out = jax.block_until_ready(attention_forward(x, params))
    ref = jax.block_until_ready(attention_reference(x, params))

    assert out.shape == x.shape
    # Tolerance covers MXU f32 precision-mode differences and the approx
    # EUP reciprocal in the softmax; structural errors would be orders larger.
    assert jnp.allclose(out, ref, atol=3e-2, rtol=3e-2), (
        float(jnp.max(jnp.abs(out - ref))))
    print("KERNEL_OK")
</pallas_src>

<mosaic_0001>
module attributes {stable_mosaic.version = 11 : i64} {
  func.func @_pointwise_kernel(%arg0: i32, %arg1: memref<256x32xf32, #tpu.memory_space<vmem>>, %arg2: memref<32x96xf32, #tpu.memory_space<vmem>>, %arg3: memref<1x96xf32, #tpu.memory_space<vmem>>, %arg4: memref<256x96xf32, #tpu.memory_space<vmem>>) attributes {dimension_semantics = [#tpu.dimension_semantics<parallel>], iteration_bounds = array<i64: 2>, scalar_prefetch = 0 : i64, scratch_operands = 0 : i64, tpu.core_type = #tpu.core_type<tc>, window_params = [{transform_indices = @transform_0, window_bounds = array<i64: 256, 32>}, {pipeline_mode = #tpu.pipeline_mode<synchronous>, transform_indices = @transform_1, window_bounds = array<i64: 32, 96>}, {pipeline_mode = #tpu.pipeline_mode<synchronous>, transform_indices = @transform_2, window_bounds = array<i64: 1, 96>}, {transform_indices = @transform_3, window_bounds = array<i64: 256, 96>}]} {
    %c0 = arith.constant 0 : index
    %c0_0 = arith.constant 0 : index
    %0 = vector.load %arg1[%c0, %c0_0] : memref<256x32xf32, #tpu.memory_space<vmem>>, vector<256x32xf32>
    %c0_1 = arith.constant 0 : index
    %c0_2 = arith.constant 0 : index
    %1 = vector.load %arg2[%c0_1, %c0_2] : memref<32x96xf32, #tpu.memory_space<vmem>>, vector<32x96xf32>
    %cst = arith.constant dense<0.000000e+00> : vector<256x96xf32>
    %2 = tpu.matmul %0, %1, %cst {dimension_numbers = #tpu.dot_dimension_numbers<[1], [0], [0], [1], [0, 0, 1, 1], [], []>} : vector<256x32xf32>, vector<32x96xf32>, vector<256x96xf32> -> vector<256x96xf32>
    %c0_3 = arith.constant 0 : index
    %c0_4 = arith.constant 0 : index
    %3 = vector.load %arg3[%c0_3, %c0_4] : memref<1x96xf32, #tpu.memory_space<vmem>>, vector<1x96xf32>
    %4 = vector.broadcast %3 : vector<1x96xf32> to vector<256x96xf32>
    %5 = arith.addf %2, %4 : vector<256x96xf32>
    %c0_5 = arith.constant 0 : index
    %c0_6 = arith.constant 0 : index
    %6 = vector.load %arg4[%c0_5, %c0_6] : memref<256x96xf32, #tpu.memory_space<vmem>>, vector<256x96xf32>
    tpu.vector_store %arg4[%c0_5, %c0_6], %5 {strides = array<i32>} : memref<256x96xf32, #tpu.memory_space<vmem>>, vector<256x96xf32>,
    return
  }
  func.func @transform_0(%arg0: i32) -> (i32, i32) {
    %c0_i32 = arith.constant 0 : i32
    %c0_i32_0 = arith.constant 0 : i32
    return %arg0, %c0_i32 : i32, i32
  }
  func.func @transform_1(%arg0: i32) -> (i32, i32) {
    %c0_i32 = arith.constant 0 : i32
    %c0_i32_0 = arith.constant 0 : i32
    %c0_i32_1 = arith.constant 0 : i32
    return %c0_i32, %c0_i32_0 : i32, i32
  }
  func.func @transform_2(%arg0: i32) -> (i32, i32) {
    %c0_i32 = arith.constant 0 : i32
    %c0_i32_0 = arith.constant 0 : i32
    %c0_i32_1 = arith.constant 0 : i32
    return %c0_i32, %c0_i32_0 : i32, i32
  }
  func.func @transform_3(%arg0: i32) -> (i32, i32) {
    %c0_i32 = arith.constant 0 : i32
    %c0_i32_0 = arith.constant 0 : i32
    return %arg0, %c0_i32 : i32, i32
  }
}

</mosaic_0001>

<bundles_post_ra>
// kernel: tpu_custom_call.1
= control target key start
LH: loop header
LB: loop body
LE: loop exit
PB: predicated region body
PF: predicated region fallthrough
CT: control target
= control target key end

     0   :  { %s808_s12 = smov 0   ;;  %s1013_s0 = inlined_call_operand.vmem [shape: f32[512,32], index: 0, kind: input, shape index: {}]   ;;  %s1014_s1 = inlined_call_operand.vmem [shape: f32[32,96], index: 1, kind: input, shape index: {}]   ;;  %s1015_s2 = inlined_call_operand.vmem [shape: f32[1,96], index: 2, kind: input, shape index: {}]   ;;  %s1016_s3 = inlined_call_operand.vmem [shape: f32[512,96], index: 3, kind: output, shape index: {}]  }
   0x1 LB: > { %s628_s13 = sadd.s32 4294967295, %s786_s12   ;;  %p632_p0 = scmp.ge.s32.totalorder %s786_s12, 1  ;;  %s786_s12 = sphi %s808_s12, %s13_s12  }
   0x2   : > { %p138_p1 = scmp.lt.s32.totalorder %s786_s12, 3 }
   0x4   : > { %p139_p2 = pnand %p632_p0, %p138_p1 }
   0x5   : > { %s633_s18 = sshll.u32 (!%p139_p2), %s628_s13, 5 }
   0x6   : > { %142 = sbr.rel (%p139_p2) target bundleno = 247 (0xf7), region = 32  ;;  %p163_p3 = scmp.lt.s32.totalorder (!%p139_p2), %s633_s18, 63 }
   0xb   : > { %v209_v0 = vld [vmem:[%s1014_s1 + $0x18] sm:$0xff]  ;;  %v208_v1 = vld [vmem:[%s1014_s1 + $0x10] sm:$0xff]  ;;  %v207_v2 = vld [vmem:[%s1014_s1 + $0x8] sm:$0xff]  ;;  %s1018_s18 = smov (!%p163_p3, %s633_s18), 63  ;;  %vm217_vm0 = vcmask 261120   ;;  %vm539_vm1 = vcmask 785408  }
   0xc   : > { %708 = vmatprep.subr.mxu0 %v209_v0  ;;  %764 = vmatprep.subr.mxu1 %v209_v0  ;;  %v206_v3 = vld [vmem:[%s1014_s1] sm:$0xff]  ;;  %s634_s23 = sshll.u32 %s1018_s18, 3 }
   0xd   : > { %709 = vmatpush3.msra.mxu0 %v209_v0  ;;  %768 = vmatpush3.msra.mxu1 %v209_v0  ;;  %s836_s26 = scalar_lea.vmem %s1013_s0, %s634_s23  ;;  %v905_v36 = vld [vmem:[%s1015_s2] ss:$0 sm:$0xff]  ;;  %s912_s4 = scalar_lea.vmem %s1016_s3, %s634_s23 }
   0xe   : > { %710 = vmatprep.subr.mxu0 %v208_v1  ;;  %765 = vmatprep.subr.mxu1 %v208_v1  ;;  %v174_v4 = vld [vmem:[%s836_s26] sm:$0xff]  ;;  %v175_v6 = vld [vmem:[%s836_s26 + $0x8] sm:$0xff]  ;;  %v176_v8 = vld [vmem:[%s836_s26 + $0x10] sm:$0xff] }
   0xf   : > { %711 = vmatpush3.msra.mxu0 %v208_v1  ;;  %769 = vmatpush3.msra.mxu1 %v208_v1  ;;  %v190_v5 = vld [vmem:[%s836_s26 + $0x80] sm:$0xff]  ;;  %v191_v7 = vld [vmem:[%s836_s26 + $0x88] sm:$0xff]  ;;  %v192_v9 = vld [vmem:[%s836_s26 + $0x90] sm:$0xff] }
  0x10   : > { %712 = vmatprep.subr.mxu0 %v207_v2  ;;  %766 = vmatprep.subr.mxu1 %v207_v2  ;;  %v177_v10 = vld [vmem:[%s836_s26 + $0x18] sm:$0xff]  ;;  %v178_v12 = vld [vmem:[%s836_s26 + $0x20] sm:$0xff]  ;;  %v179_v14 = vld [vmem:[%s836_s26 + $0x28] sm:$0xff] }
  0x11   : > { %713 = vmatpush3.msra.mxu0 %v207_v2  ;;  %770 = vmatpush3.msra.mxu1 %v207_v2  ;;  %v193_v11 = vld [vmem:[%s836_s26 + $0x98] sm:$0xff]  ;;  %v194_v13 = vld [vmem:[%s836_s26 + $0xa0] sm:$0xff]  ;;  %v195_v15 = vld [vmem:[%s836_s26 + $0xa8] sm:$0xff] }
  0x12   : > { %714 = vmatprep.subr.mxu0 %v206_v3  ;;  %767 = vmatprep.subr.mxu1 %v206_v3  ;;  %v180_v16 = vld [vmem:[%s836_s26 + $0x30] sm:$0xff]  ;;  %v181_v18 = vld [vmem:[%s836_s26 + $0x38] sm:$0xff]  ;;  %v182_v20 = vld [vmem:[%s836_s26 + $0x40] sm:$0xff] }
  0x13   : > { %715 = vmatpush3.msra.mxu0 %v206_v3  ;;  %771 = vmatpush3.msra.mxu1 %v206_v3  ;;  %v196_v17 = vld [vmem:[%s836_s26 + $0xb0] sm:$0xff]  ;;  %v197_v19 = vld [vmem:[%s836_s26 + $0xb8] sm:$0xff]  ;;  %v198_v21 = vld [vmem:[%s836_s26 + $0xc0] sm:$0xff] }
  0x14   : > { %716 = vmatprep.mubr.msk.f32.mxu0 %vm217_vm0, %v174_v4  ;;  %740 = vmatprep.mubr.msk.f32.mxu1 %vm217_vm0, %v190_v5  ;;  %v183_v22 = vld [vmem:[%s836_s26 + $0x48] sm:$0xff]  ;;  %v184_v24 = vld [vmem:[%s836_s26 + $0x50] sm:$0xff]  ;;  %v185_v26 = vld [vmem:[%s836_s26 + $0x58] sm:$0xff] }
  0x15   : > { %717 = vmatmul.mubr.msk.f32.vlgmr.msra.gmra.mxu0 %vm217_vm0, %v175_v6  ;;  %741 = vmatmul.mubr.msk.f32.vlgmr.msra.gmra.mxu1 %vm217_vm0, %v191_v7  ;;  %v199_v23 = vld [vmem:[%s836_s26 + $0xc8] sm:$0xff]  ;;  %v200_v25 = vld [vmem:[%s836_s26 + $0xd0] sm:$0xff]  ;;  %v201_v27 = vld [vmem:[%s836_s26 + $0xd8] sm:$0xff] }
  0x16   : > { %719 = vmatprep.mubr.msk.f32.mxu0 %vm217_vm0, %v176_v8  ;;  %743 = vmatprep.mubr.msk.f32.mxu1 %vm217_vm0, %v192_v9  ;;  %v186_v28 = vld [vmem:[%s836_s26 + $0x60] sm:$0xff]  ;;  %v187_v30 = vld [vmem:[%s836_s26 + $0x68] sm:$0xff]  ;;  %v188_v32 = vld [vmem:[%s836_s26 + $0x70] sm:$0xff] }
  0x17   : > { %v202_v29 = vld [vmem:[%s836_s26 + $0xe0] sm:$0xff]  ;;  %v203_v31 = vld [vmem:[%s836_s26 + $0xe8] sm:$0xff]  ;;  %v204_v33 = vld [vmem:[%s836_s26 + $0xf0] sm:$0xff] }
  0x18   : > { %v189_v34 = vld [vmem:[%s836_s26 + $0x78] sm:$0xff] }
  0x19   : > { %720 = vmatmul.mubr.msk.f32.gmra.mxu0 %vm217_vm0, %v177_v10  ;;  %744 = vmatmul.mubr.msk.f32.gmra.mxu1 %vm217_vm0, %v193_v11  ;;  %v205_v35 = vld [vmem:[%s836_s26 + $0xf8] sm:$0xff] }
  0x1a   : > { %722 = vmatprep.mubr.msk.f32.mxu0 %vm217_vm0, %v178_v12  ;;  %746 = vmatprep.mubr.msk.f32.mxu1 %vm217_vm0, %v194_v13 }
  0x1d   : > { %723 = vmatmul.mubr.msk.f32.gmra.mxu0 %vm217_vm0, %v179_v14  ;;  %747 = vmatmul.mubr.msk.f32.gmra.mxu1 %vm217_vm0, %v195_v15 }
  0x1e   : > { %725 = vmatprep.mubr.msk.f32.mxu0 %vm217_vm0, %v180_v16  ;;  %749 = vmatprep.mubr.msk.f32.mxu1 %vm217_vm0, %v196_v17 }
  0x21   : > { %726 = vmatmul.mubr.msk.f32.gmra.mxu0 %vm217_vm0, %v181_v18  ;;  %750 = vmatmul.mubr.msk.f32.gmra.mxu1 %vm217_vm0, %v197_v19 }
  0x22   : > { %728 = vmatprep.mubr.msk.f32.mxu0 %vm217_vm0, %v182_v20  ;;  %752 = vmatprep.mubr.msk.f32.mxu1 %vm217_vm0, %v198_v21 }
  0x25   : > { %729 = vmatmul.mubr.msk.f32.gmra.mxu0 %vm217_vm0, %v183_v22  ;;  %753 = vmatmul.mubr.msk.f32.gmra.mxu1 %vm217_vm0, %v199_v23 }
  0x26   : > { %731 = vmatprep.mubr.msk.f32.mxu0 %vm217_vm0, %v184_v24  ;;  %755 = vmatprep.mubr.msk.f32.mxu1 %vm217_vm0, %v200_v25 }
  0x29   : > { %732 = vmatmul.mubr.msk.f32.gmra.mxu0 %vm217_vm0, %v185_v26  ;;  %756 = vmatmul.mubr.msk.f32.gmra.mxu1 %vm217_vm0, %v201_v27 }
  0x2a   : > { %734 = vmatprep.mubr.msk.f32.mxu0 %vm217_vm0, %v186_v28  ;;  %758 = vmatprep.mubr.msk.f32.mxu1 %vm217_vm0, %v202_v29 }
  0x2d   : > { %735 = vmatmul.mubr.msk.f32.gmra.mxu0 %vm217_vm0, %v187_v30  ;;  %759 = vmatmul.mubr.msk.f32.gmra.mxu1 %vm217_vm0, %v203_v31 }
  0x2e   : > { %737 = vmatprep.mubr.msk.f32.mxu0 %vm217_vm0, %v188_v32  ;;  %761 = vmatprep.mubr.msk.f32.mxu1 %vm217_vm0, %v204_v33 }
  0x31   : > { %738 = vmatmul.mubr.msk.f32.gmra.mxu0 %vm217_vm0, %v189_v34  ;;  %762 = vmatmul.mubr.msk.f32.gmra.mxu1 %vm217_vm0, %v205_v35 }
  0xd5   : > { %v718_v37 = vpop.f32.mrf.mxu0  ;;  %v742_v38 = vpop.f32.mrf.mxu1 }
  0xd6   : > { %v386_v39 = vadd.f32 %v718_v37, %v905_v36  ;;  %v466_v40 = vadd.f32 %v742_v38, %v905_v36 }
  0xd7   : > { %v380_v41 = vpop.f32.mrf.mxu0  ;;  %v460_v42 = vpop.f32.mrf.mxu1 }
  0xd8   : > { %541 = vst.msk [vmem:[%s912_s4 + $0x8] sm:$0xff] %vm539_vm1, %v386_v39  ;;  %557 = vst.msk [vmem:[%s912_s4 + $0x88] sm:$0xff] %vm539_vm1, %v466_v40  ;;  %v381_v43 = vadd.f32 %v905_v36, %v380_v41  ;;  %v461_v44 = vadd.f32 %v905_v36, %v460_v42 }
  0xd9   : > { %v721_v45 = vpop.f32.mrf.mxu0  ;;  %v745_v46 = vpop.f32.mrf.mxu1 }
  0xda   : > { %540 = vst.msk [vmem:[%s912_s4] sm:$0xff] %vm539_vm1, %v381_v43  ;;  %556 = vst.msk [vmem:[%s912_s4 + $0x80] sm:$0xff] %vm539_vm1, %v461_v44  ;;  %v396_v47 = vadd.f32 %v721_v45, %v905_v36  ;;  %v476_v48 = vadd.f32 %v745_v46, %v905_v36 }
  0xdb   : > { %v390_v49 = vpop.f32.mrf.mxu0  ;;  %v470_v50 = vpop.f32.mrf.mxu1 }
  0xdc   : > { %543 = vst.msk [vmem:[%s912_s4 + $0x18] sm:$0xff] %vm539_vm1, %v396_v47  ;;  %559 = vst.msk [vmem:[%s912_s4 + $0x98] sm:$0xff] %vm539_vm1, %v476_v48  ;;  %v391_v51 = vadd.f32 %v905_v36, %v390_v49  ;;  %v471_v52 = vadd.f32 %v905_v36, %v470_v50 }
  0xdd   : > { %v724_v53 = vpop.f32.mrf.mxu0  ;;  %v748_v54 = vpop.f32.mrf.mxu1 }
  0xde   : > { %542 = vst.msk [vmem:[%s912_s4 + $0x10] sm:$0xff] %vm539_vm1, %v391_v51  ;;  %558 = vst.msk [vmem:[%s912_s4 + $0x90] sm:$0xff] %vm539_vm1, %v471_v52  ;;  %v406_v55 = vadd.f32 %v724_v53, %v905_v36  ;;  %v486_v56 = vadd.f32 %v748_v54, %v905_v36 }
  0xdf   : > { %v400_v57 = vpop.f32.mrf.mxu0  ;;  %v480_v58 = vpop.f32.mrf.mxu1 }
  0xe0   : > { %545 = vst.msk [vmem:[%s912_s4 + $0x28] sm:$0xff] %vm539_vm1, %v406_v55  ;;  %561 = vst.msk [vmem:[%s912_s4 + $0xa8] sm:$0xff] %vm539_vm1, %v486_v56  ;;  %v401_v59 = vadd.f32 %v905_v36, %v400_v57  ;;  %v481_v60 = vadd.f32 %v905_v36, %v480_v58 }
  0xe1   : > { %v727_v61 = vpop.f32.mrf.mxu0  ;;  %v751_v62 = vpop.f32.mrf.mxu1 }
  0xe2   : > { %544 = vst.msk [vmem:[%s912_s4 + $0x20] sm:$0xff] %vm539_vm1, %v401_v59  ;;  %560 = vst.msk [vmem:[%s912_s4 + $0xa0] sm:$0xff] %vm539_vm1, %v481_v60  ;;  %v416_v63 = vadd.f32 %v727_v61, %v905_v36  ;;  %v496_v0 = vadd.f32 %v751_v62, %v905_v36 }
  0xe3   : > { %v410_v1 = vpop.f32.mrf.mxu0  ;;  %v490_v2 = vpop.f32.mrf.mxu1 }
  0xe4   : > { %547 = vst.msk [vmem:[%s912_s4 + $0x38] sm:$0xff] %vm539_vm1, %v416_v63  ;;  %563 = vst.msk [vmem:[%s912_s4 + $0xb8] sm:$0xff] %vm539_vm1, %v496_v0  ;;  %v411_v3 = vadd.f32 %v905_v36, %v410_v1  ;;  %v491_v4 = vadd.f32 %v905_v36, %v490_v2 }
  0xe5   : > { %v730_v5 = vpop.f32.mrf.mxu0  ;;  %v754_v6 = vpop.f32.mrf.mxu1 }
  0xe6   : > { %546 = vst.msk [vmem:[%s912_s4 + $0x30] sm:$0xff] %vm539_vm1, %v411_v3  ;;  %562 = vst.msk [vmem:[%s912_s4 + $0xb0] sm:$0xff] %vm539_vm1, %v491_v4  ;;  %v426_v7 = vadd.f32 %v730_v5, %v905_v36  ;;  %v506_v8 = vadd.f32 %v754_v6, %v905_v36 }
  0xe7   : > { %v420_v9 = vpop.f32.mrf.mxu0  ;;  %v500_v10 = vpop.f32.mrf.mxu1 }
  0xe8   : > { %549 = vst.msk [vmem:[%s912_s4 + $0x48] sm:$0xff] %vm539_vm1, %v426_v7  ;;  %565 = vst.msk [vmem:[%s912_s4 + $0xc8] sm:$0xff] %vm539_vm1, %v506_v8  ;;  %v421_v11 = vadd.f32 %v905_v36, %v420_v9  ;;  %v501_v12 = vadd.f32 %v905_v36, %v500_v10 }
  0xe9   : > { %v733_v13 = vpop.f32.mrf.mxu0  ;;  %v757_v14 = vpop.f32.mrf.mxu1 }
  0xea   : > { %548 = vst.msk [vmem:[%s912_s4 + $0x40] sm:$0xff] %vm539_vm1, %v421_v11  ;;  %564 = vst.msk [vmem:[%s912_s4 + $0xc0] sm:$0xff] %vm539_vm1, %v501_v12  ;;  %v436_v15 = vadd.f32 %v733_v13, %v905_v36  ;;  %v516_v16 = vadd.f32 %v757_v14, %v905_v36 }
  0xeb   : > { %v430_v17 = vpop.f32.mrf.mxu0  ;;  %v510_v18 = vpop.f32.mrf.mxu1 }
  0xec   : > { %551 = vst.msk [vmem:[%s912_s4 + $0x58] sm:$0xff] %vm539_vm1, %v436_v15  ;;  %567 = vst.msk [vmem:[%s912_s4 + $0xd8] sm:$0xff] %vm539_vm1, %v516_v16  ;;  %v431_v19 = vadd.f32 %v905_v36, %v430_v17  ;;  %v511_v20 = vadd.f32 %v905_v36, %v510_v18 }
  0xed   : > { %v736_v21 = vpop.f32.mrf.mxu0  ;;  %v760_v22 = vpop.f32.mrf.mxu1 }
  0xee   : > { %550 = vst.msk [vmem:[%s912_s4 + $0x50] sm:$0xff] %vm539_vm1, %v431_v19  ;;  %566 = vst.msk [vmem:[%s912_s4 + $0xd0] sm:$0xff] %vm539_vm1, %v511_v20  ;;  %v446_v23 = vadd.f32 %v736_v21, %v905_v36  ;;  %v526_v24 = vadd.f32 %v760_v22, %v905_v36 }
  0xef   : > { %v440_v25 = vpop.f32.mrf.mxu0  ;;  %v520_v26 = vpop.f32.mrf.mxu1 }
  0xf0   : > { %553 = vst.msk [vmem:[%s912_s4 + $0x68] sm:$0xff] %vm539_vm1, %v446_v23  ;;  %569 = vst.msk [vmem:[%s912_s4 + $0xe8] sm:$0xff] %vm539_vm1, %v526_v24  ;;  %v441_v27 = vadd.f32 %v905_v36, %v440_v25  ;;  %v521_v28 = vadd.f32 %v905_v36, %v520_v26 }
  0xf1   : > { %v739_v29 = vpop.f32.mrf.mxu0  ;;  %v763_v30 = vpop.f32.mrf.mxu1 }
  0xf2   : > { %552 = vst.msk [vmem:[%s912_s4 + $0x60] sm:$0xff] %vm539_vm1, %v441_v27  ;;  %568 = vst.msk [vmem:[%s912_s4 + $0xe0] sm:$0xff] %vm539_vm1, %v521_v28  ;;  %v456_v31 = vadd.f32 %v739_v29, %v905_v36  ;;  %v536_v32 = vadd.f32 %v763_v30, %v905_v36 }
  0xf3   : > { %v450_v33 = vpop.f32.mrf.mxu0  ;;  %v530_v34 = vpop.f32.mrf.mxu1 }
  0xf4   : > { %555 = vst.msk [vmem:[%s912_s4 + $0x78] sm:$0xff] %vm539_vm1, %v456_v31  ;;  %571 = vst.msk [vmem:[%s912_s4 + $0xf8] sm:$0xff] %vm539_vm1, %v536_v32  ;;  %v451_v35 = vadd.f32 %v905_v36, %v450_v33  ;;  %v531_v37 = vadd.f32 %v905_v36, %v530_v34 }
  0xf6   : > { %554 = vst.msk [vmem:[%s912_s4 + $0x70] sm:$0xff] %vm539_vm1, %v451_v35  ;;  %570 = vst.msk [vmem:[%s912_s4 + $0xf0] sm:$0xff] %vm539_vm1, %v531_v37 }
  0xf7 PF: > { %s13_s12 = sadd.s32 1, %s786_s12  }
  0xf8   : > { %p10_p4 = scmp.ge.s32.totalorder %s13_s12, 4  }
  0xfa   :  { %12 = sbr.rel (!%p10_p4) target bundleno = 1 (0x1), region = 62 }

</bundles_post_ra>
